<compile_context>
chip_gen: v6e
topology: v6e:2x2x1
jax: 0.10.0
libtpu: 0.0.40
codegen_flags: <defaults>
</compile_context>

<pallas_src>
import jax
import jax.numpy as jnp
from jax.experimental import pallas as pl
from jax.experimental.pallas import tpu as pltpu

_VMEM_LIMIT_BYTES = 32 * 1024 * 1024      # safe on v5e / v6e / v7x
_TILE_BUDGET_BYTES = 12 * 1024 * 1024     # target double-buffered block footprint
_TM_CAP = 1024                            # keep enough grid steps for megacore


def _swiglu_split_kernel(out_ref, gate_ref, o_ref):
    # out_ref / gate_ref / o_ref: (tm, tn) lane-dense tiles.
    out = out_ref[...].astype(jnp.float32)
    gate = gate_ref[...].astype(jnp.float32)
    o_ref[...] = (out * (gate * jax.nn.sigmoid(gate))).astype(o_ref.dtype)


def _swiglu_fused_kernel(x_ref, o_ref):
    # x_ref: (tm, 2*D) with D small / not lane-aligned; slice in-kernel.
    d = o_ref.shape[-1]
    x = x_ref[...].astype(jnp.float32)
    out = x[:, :d]
    gate = x[:, d:]
    o_ref[...] = (out * (gate * jax.nn.sigmoid(gate))).astype(o_ref.dtype)


def _pick_tm(rows, doublebuf_bytes_per_row):
    """Largest multiple-of-8 row tile within the VMEM budget (capped)."""
    tm = _TILE_BUDGET_BYTES // max(doublebuf_bytes_per_row, 1)
    tm = max(8, min(tm, _TM_CAP))
    tm = (tm // 8) * 8
    rows_up = ((rows + 7) // 8) * 8   # no point tiling past the (padded) row count
    tm = min(tm, rows_up)
    return max(tm, 8)


def swiglu(x):
    """x: (..., 2*D) -> (..., D); matches torch chunk(2, dim=-1) + silu gating."""
    *lead, two_d = x.shape
    assert two_d % 2 == 0, "last dim must be even for SwiGLU chunk(2)"
    d = two_d // 2

    rows = 1
    for s in lead:
        rows *= s
    x2d = x.reshape(rows, two_d)
    dtype_bytes = jnp.dtype(x.dtype).itemsize

    if d % 128 == 0:
        # --- lane-aligned path: two BlockSpecs into the same array ------------
        tn = next(c for c in (1024, 512, 256, 128) if d % c == 0)
        n_blocks_d = d // tn
        # 2 buffers x (2 input blocks + 1 output block) per row of tile
        per_row = 2 * 3 * tn * dtype_bytes
        tm = _pick_tm(rows, per_row)
        grid = (pl.cdiv(rows, tm), n_blocks_d)

        out_spec_in = pl.BlockSpec((tm, tn), lambda i, j: (i, j))
        gate_spec_in = pl.BlockSpec((tm, tn), lambda i, j: (i, j + n_blocks_d))

        out2d = pl.pallas_call(
            _swiglu_split_kernel,
            out_shape=jax.ShapeDtypeStruct((rows, d), x.dtype),
            grid_spec=pltpu.PrefetchScalarGridSpec(
                num_scalar_prefetch=0,
                grid=grid,
                in_specs=[out_spec_in, gate_spec_in],
                out_specs=pl.BlockSpec((tm, tn), lambda i, j: (i, j)),
            ),
            compiler_params=pltpu.CompilerParams(
                dimension_semantics=("parallel", "parallel"),
                vmem_limit_bytes=_VMEM_LIMIT_BYTES,
            ),
        )(x2d, x2d)
    else:
        # --- small / unaligned hidden dim: full last-dim block ----------------
        # (A split at column d would itself be lane-misaligned; keep one block.)
        per_row = 2 * 3 * d * dtype_bytes  # 2 bufs x (2d input + d output)
        tm = _pick_tm(rows, per_row)
        grid = (pl.cdiv(rows, tm),)

        out2d = pl.pallas_call(
            _swiglu_fused_kernel,
            out_shape=jax.ShapeDtypeStruct((rows, d), x.dtype),
            grid_spec=pltpu.PrefetchScalarGridSpec(
                num_scalar_prefetch=0,
                grid=grid,
                in_specs=[pl.BlockSpec((tm, two_d), lambda i: (i, 0))],
                out_specs=pl.BlockSpec((tm, d), lambda i: (i, 0)),
            ),
            compiler_params=pltpu.CompilerParams(
                dimension_semantics=("parallel",),
                vmem_limit_bytes=_VMEM_LIMIT_BYTES,
            ),
        )(x2d)

    return out2d.reshape(*lead, d)


def swiglu_ref(x):
    d = x.shape[-1] // 2
    out, gate = x[..., :d], x[..., d:]
    return out * (gate * jax.nn.sigmoid(gate))


if __name__ == "__main__":
    key = jax.random.PRNGKey(0)
    k0, k1, k2 = jax.random.split(key, 3)

    # 1) Original small test case: D=32 (unaligned -> fused path).
    B, S, H = 2, 8, 32
    x = jax.random.normal(k0, (B, S, 2 * H), dtype=jnp.float32)
    y = swiglu(x)
    jax.block_until_ready(y)
    assert y.shape == (B, S, H)
    assert jnp.allclose(y, swiglu_ref(x), atol=1e-5, rtol=1e-5)

    # 2) Lane-aligned hidden dim: D=256 (split two-BlockSpec path), f32.
    H2 = 256
    x2 = jax.random.normal(k1, (B, S, 2 * H2), dtype=jnp.float32)
    y2 = swiglu(x2)
    jax.block_until_ready(y2)
    assert y2.shape == (B, S, H2)
    assert jnp.allclose(y2, swiglu_ref(x2), atol=1e-5, rtol=1e-5)

    # 3) bf16 input on the aligned path (kernel upcasts to f32 internally).
    x3 = jax.random.normal(k2, (B, S, 2 * H2), dtype=jnp.float32).astype(jnp.bfloat16)
    y3 = swiglu(x3)
    jax.block_until_ready(y3)
    ref3 = swiglu_ref(x3.astype(jnp.float32))
    assert jnp.allclose(y3.astype(jnp.float32), ref3, atol=2e-2, rtol=2e-2)

    print("KERNEL_OK")
</pallas_src>

<mosaic_0001>
module attributes {stable_mosaic.version = 11 : i64} {
  func.func @_swiglu_fused_kernel(%arg0: i32, %arg1: memref<16x64xf32, #tpu.memory_space<vmem>>, %arg2: memref<16x32xf32, #tpu.memory_space<vmem>>) attributes {dimension_semantics = [#tpu.dimension_semantics<parallel>], iteration_bounds = array<i64: 1>, scalar_prefetch = 0 : i64, scratch_operands = 0 : i64, tpu.core_type = #tpu.core_type<tc>, window_params = [{transform_indices = @transform_0, window_bounds = array<i64: 16, 64>}, {transform_indices = @transform_1, window_bounds = array<i64: 16, 32>}]} {
    %c0 = arith.constant 0 : index
    %c0_0 = arith.constant 0 : index
    %0 = vector.load %arg1[%c0, %c0_0] : memref<16x64xf32, #tpu.memory_space<vmem>>, vector<16x64xf32>
    %1 = vector.extract_strided_slice %0 {offsets = [0, 0], sizes = [16, 32], strides = [1, 1]} : vector<16x64xf32> to vector<16x32xf32>
    %2 = vector.extract_strided_slice %0 {offsets = [0, 32], sizes = [16, 32], strides = [1, 1]} : vector<16x64xf32> to vector<16x32xf32>
    %3 = arith.negf %2 : vector<16x32xf32>
    %4 = math.exp %3 : vector<16x32xf32>
    %cst = arith.constant 1.000000e+00 : f32
    %5 = vector.broadcast %cst : f32 to vector<16x32xf32>
    %6 = arith.addf %5, %4 : vector<16x32xf32>
    %7 = arith.divf %5, %6 : vector<16x32xf32>
    %8 = arith.mulf %2, %7 : vector<16x32xf32>
    %9 = arith.mulf %1, %8 : vector<16x32xf32>
    %c0_1 = arith.constant 0 : index
    %c0_2 = arith.constant 0 : index
    %10 = vector.load %arg2[%c0_1, %c0_2] : memref<16x32xf32, #tpu.memory_space<vmem>>, vector<16x32xf32>
    tpu.vector_store %arg2[%c0_1, %c0_2], %9 {strides = array<i32>} : memref<16x32xf32, #tpu.memory_space<vmem>>, vector<16x32xf32>,
    return
  }
  func.func @transform_0(%arg0: i32) -> (i32, i32) {
    %c0_i32 = arith.constant 0 : i32
    %c0_i32_0 = arith.constant 0 : i32
    return %arg0, %c0_i32 : i32, i32
  }
  func.func @transform_1(%arg0: i32) -> (i32, i32) {
    %c0_i32 = arith.constant 0 : i32
    %c0_i32_0 = arith.constant 0 : i32
    return %arg0, %c0_i32 : i32, i32
  }
}

</mosaic_0001>

<bundles_post_ra>
// kernel: tpu_custom_call.1
= control target key start
LH: loop header
LB: loop body
LE: loop exit
PB: predicated region body
PF: predicated region fallthrough
CT: control target
= control target key end

     0   :  { %6 = vsyncpa [#allocation3], 0  ;;  %s155_s0 = inlined_call_operand.hbm [shape: f32[16,64], index: 0, kind: input, shape index: {}]   ;;  %s156_s1 = inlined_call_operand.hbm [shape: f32[16,32], index: 1, kind: output, shape index: {}]  }
   0x1   :  { %7 = vsyncpa [#allocation4], 0  ;;  %s128_s6 = smov [#allocation2]  }
   0x2   :  { %s13_s7 = sshll.u32 %s128_s6, 4  ;;  %s14_s7 = int_to_ptr.vmem [resolvable:$true] %s13_s7 }
   0x3   :  { %s92_s8 = scalar_lea.vmem %s14_s7, 256  ;;  %p97_p1 = scmp.lt.s32.totalorder %s14_s7, %s14_s7 }
   0x4   :  { %p93_p0 = scmp.ne.s32.totalorder %s14_s7, %s92_s8  ;;  %p98_p2 = scmp.lt.s32.totalorder %s92_s8, %s92_s8 }
   0x6   :  { %p99_p3 = por %p98_p2, %p97_p1 }
   0x8   :  { %p100_p4 = pnand %p99_p3, %p93_p0 }
   0xa   :  { %103 = shalt.err (!%p100_p4)
}
   0xb   :  { %s129_s9 = smov 128   ;;  %s130_s10 = smov 8  }
   0xc   :  { %19 = dma.hbm_to_vmem [thread:$0]  %s155_s0, 256, %s14_s7, [#allocation3], %s129_s9, %s129_s9, %s130_s10  }
   0xd   :  { %124 = dma.done.wait [#allocation3], 256  }
   0xe   :  { %125 = vsyncadd [#allocation3], 4294967040  ;;  %v23_v0 = vld [vmem:[#allocation2] sm:$0xff]  ;;  %v24_v1 = vld [vmem:[#allocation2 + $0x8] sm:$0xff]  ;;  %s131_s13 = smov 96   ;;  %vm49_vm0 = vcmask 261120  }
   0xf   :  { %v69_v2 = vmul.f32 -1.442695, %v23_v0  ;;  %v70_v3 = vmul.f32 -1.442695, %v24_v1  ;;  %s132_s0 = smov [#allocation5]  }
  0x10   :  { %s57_s14 = sshll.u32 %s132_s0, 4  ;;  %s58_s14 = int_to_ptr.vmem [resolvable:$true] %s57_s14 }
  0x11   :  { %76 = vpow2.f32 %v69_v2  ;;  %s104_s15 = scalar_lea.vmem %s58_s14, 256  ;;  %p109_p6 = scmp.lt.s32.totalorder %s58_s14, %s58_s14 }
  0x12   :  { %78 = vpow2.f32 %v70_v3  ;;  %p105_p5 = scmp.ne.s32.totalorder %s58_s14, %s104_s15  ;;  %p110_p7 = scmp.lt.s32.totalorder %s104_s15, %s104_s15 }
  0x14   :  { %p111_p8 = por %p110_p7, %p109_p6 }
  0x16   :  { %p112_p9 = pnand %p111_p8, %p105_p5 }
  0x1e   :  { %v77_v4 = vpop.eup %76 }
  0x1f   :  { %v79_v5 = vpop.eup %78  ;;  %v31_v6 = vadd.f32 1.0, %v77_v4 }
  0x20   :  { %v32_v7 = vadd.f32 1.0, %v79_v5 }
  0x21   :  { %80 = vrcp.f32 %v31_v6 }
  0x22   :  { %82 = vrcp.f32 %v32_v7 }
  0x2e   :  { %v81_v8 = vpop.eup %80 }
  0x2f   :  { %v83_v9 = vpop.eup %82  ;;  %v37_v10 = vmul.f32 %v81_v8, %v23_v0 }
  0x30   :  { %v38_v11 = vmul.f32 %v83_v9, %v24_v1 }
  0x31   :  { %41 = vrot.lane.b32.xlu0 %v37_v10, %s131_s13 }
  0x35   :  { %43 = vrot.lane.b32.xlu0 %v38_v11, %s131_s13 }
  0xa3   :  { %v42_v12 = vpop.permute.xlu0 %41 }
  0xa4   :  { %v47_v13 = vmul.f32 %v42_v12, %v23_v0 }
  0xa6   :  { %50 = vst.msk [vmem:[#allocation5] sm:$0xff] %vm49_vm0, %v47_v13 }
  0xa7   :  { %v44_v14 = vpop.permute.xlu0 %43 }
  0xa8   :  { %v48_v15 = vmul.f32 %v44_v14, %v24_v1 }
  0xaa   :  { %51 = vst.msk [vmem:[#allocation5 + $0x8] sm:$0xff] %vm49_vm0, %v48_v15 }
  0xab   :  { %115 = shalt.err (!%p112_p9)
}
  0xac   :  { %63 = dma.vmem_to_hbm [thread:$0]  %s58_s14, 256, %s156_s1, [#allocation4], %s129_s9, %s129_s9, %s130_s10  }
  0xad   :  { %126 = dma.done.wait [#allocation4], 256  }
  0xae   :  { %127 = vsyncadd [#allocation4], 4294967040 }
  0xaf   :  { %67 = vsyncpa [#allocation3], 1 }
  0xb0   :  { %68 = vsyncpa [#allocation4], 1 }

</bundles_post_ra>
